<compile_context>
chip_gen: v5e
topology: v5e:2x2
jax: 0.10.0
libtpu: 0.0.40
codegen_flags: <defaults>
</compile_context>

<pallas_src>
import numpy as np
import jax
import jax.numpy as jnp
from jax.experimental import pallas as pl
from jax.experimental.pallas import tpu as pltpu

NUM_QUBITS = 3
DIM = 2 ** NUM_QUBITS            # 8   = 2^N
OUT_SIZE = 4 ** NUM_QUBITS       # 64  (mixed state -> T_m is DIM x DIM)
HIDDEN = 2 * NUM_QUBITS          # 6   (net_type='learn')
H_AUG = HIDDEN + 1               # 7   hidden + constant-1 feature (carries b2)
K_POVM = 4                       # tetrahedral POVM, 4 outcomes / qubit
NUM_P = K_POVM ** NUM_QUBITS     # 64  total probabilities
CDIM = 2 * DIM                   # 16  columns of C = [Re(T) | Im(T)]
CLANES = DIM * CDIM              # 128 length of vec(C)
GLANES = CDIM * CDIM             # 256 length of vec(G),  G = C^T C


# ------------------------------ fused forward kernel ------------------------------
def generator_kernel(alpha_ref, x_ref, w1a_ref, b1a_ref, tspr_ref, trep_ref,
                     trrow_ref, mout_ref, out_ref):
    # --- MLP layer 1 (+ constant-1 feature) and PReLU ---
    h = (jnp.dot(x_ref[...], w1a_ref[...], preferred_element_type=jnp.float32)
         + b1a_ref[...])                                  # (1, 7); last lane == 1
    a = alpha_ref[0]                                      # PReLU slope (num_parameters=1)
    h = jnp.where(h > 0, h, a * h)                        # PReLU(1) == 1, keeps bias lane

    # --- all pairwise products h_k * h_l, laid out on 49 lanes ---
    h2 = (jnp.dot(h, tspr_ref[...], preferred_element_type=jnp.float32)
          * jnp.dot(h, trep_ref[...], preferred_element_type=jnp.float32))   # (1, 49)

    # --- tr(T^H T) via the Gram fold ---
    trace = jnp.sum(h2 * trrow_ref[...])
    inv = 1.0 / trace            # exact divide; single scalar op, approx recip not worth it

    # --- measured probabilities: chol_h + T^H T + POVM + gather all folded in Mout ---
    out_ref[...] = (jnp.dot(h2, mout_ref[...],
                            preferred_element_type=jnp.float32) * inv)


def generator_forward(x, alpha, w1a, b1a, tspr, trep, trrow, mout):
    n_meas = mout.shape[1]
    vmem = lambda: pl.BlockSpec(memory_space=pltpu.MemorySpace.VMEM)
    out = pl.pallas_call(
        generator_kernel,
        out_shape=jax.ShapeDtypeStruct((1, n_meas), jnp.float32),
        in_specs=[pl.BlockSpec(memory_space=pltpu.MemorySpace.SMEM)]   # alpha scalar
                 + [vmem() for _ in range(7)],
        out_specs=vmem(),
    )(alpha, x.reshape(1, -1), w1a, b1a, tspr, trep, trrow, mout)
    return out[0]                                                      # (n_meas,)


# ----------------------------- host-side parameter folding -----------------------------
def build_chol_fold():
    """Q (64,128): vec(T_m) -> vec([Re(T) | Im(T)]) for chol_h / mixed.

    Final T (Hermitian):  i>j: Re=T_m[i,j], Im=T_m[j,i]
                          i=j: Re=T_m[i,i], Im=0
                          i<j: Re=T_m[j,i], Im=-T_m[i,j]
    vec(C) index = 16*i + m  with  C[i, :8]=Re(T)[i,:],  C[i, 8:]=Im(T)[i,:].
    """
    q = np.zeros((DIM * DIM, CLANES), np.float64)
    for i in range(DIM):
        for j in range(DIM):
            pr = CDIM * i + j            # column of Re(T)[i,j]
            pi = CDIM * i + DIM + j      # column of Im(T)[i,j]
            if i > j:
                q[DIM * i + j, pr] += 1.0
                q[DIM * j + i, pi] += 1.0
            elif i == j:
                q[DIM * i + j, pr] += 1.0
            else:
                q[DIM * j + i, pr] += 1.0
                q[DIM * i + j, pi] -= 1.0
    return q


def build_measure_matrix(kron_ops, p_idxs):
    """Bg (256, len(p_idxs)):  P_pre[P_idxs] = vec(G) @ Bg,  G = C^T C.

    temp_r = G[:8,:8]+G[8:,8:],  temp_i = G[:8,8:]-G[8:,:8]
    P_pre[k] = sum_{ij} temp_r[i,j]*Re(A_k[j,i]) - temp_i[i,j]*Im(A_k[j,i]).
    """
    ar = np.real(kron_ops).astype(np.float64)      # (NUM_P, 8, 8)
    ai = np.imag(kron_ops).astype(np.float64)
    bg = np.zeros((GLANES, NUM_P), np.float64)
    for a in range(CDIM):
        for b in range(CDIM):
            r = CDIM * a + b
            if a < DIM and b < DIM:
                bg[r] = ar[:, b, a]
            elif a >= DIM and b >= DIM:
                bg[r] = ar[:, b - DIM, a - DIM]
            elif a < DIM and b >= DIM:
                bg[r] = -ai[:, b - DIM, a]
            else:
                bg[r] = ai[:, b, a - DIM]
    return bg[:, np.asarray(p_idxs)]


def build_gram_fold(w2c_aug):
    """Gram2 (H_AUG^2, 256):  vec(G)[16a+b] = sum_{k,l} h_aug[k]h_aug[l] Gram2[7k+l, 16a+b].

    With C = sum_k h_aug[k] * W3[k] (W3[k] = reshape of row k of w2c_aug to (8,16)),
    G = C^T C  =>  Gram2[7k+l, 16a+b] = sum_i W3[k][i,a] * W3[l][i,b].
    """
    w3 = w2c_aug.reshape(H_AUG, DIM, CDIM)                  # (7, 8, 16)
    gram = np.einsum('kia,lib->klab', w3, w3)               # (7, 7, 16, 16)
    return gram.reshape(H_AUG * H_AUG, GLANES)


def build_h2_maps():
    """Tspr/Trep (7,49): h2 = (h_aug @ Tspr) * (h_aug @ Trep) with h2[7k+l]=h[k]*h[l]."""
    idx = np.arange(H_AUG * H_AUG)
    k = idx // H_AUG
    l = idx % H_AUG
    tspr = (np.arange(H_AUG)[:, None] == k[None, :]).astype(np.float64)
    trep = (np.arange(H_AUG)[:, None] == l[None, :]).astype(np.float64)
    return tspr, trep


# ----------------------------- POVM / parameter setup -----------------------------
def tetrahedral_povm():
    s = np.array([[0.0, 0.0, 1.0],
                  [2.0 * np.sqrt(2.0) / 3.0, 0.0, -1.0 / 3.0],
                  [-np.sqrt(2.0) / 3.0, np.sqrt(2.0 / 3.0), -1.0 / 3.0],
                  [-np.sqrt(2.0) / 3.0, -np.sqrt(2.0 / 3.0), -1.0 / 3.0]])
    sx = np.array([[0, 1], [1, 0]], dtype=np.complex64)
    sy = np.array([[0, -1j], [1j, 0]], dtype=np.complex64)
    sz = np.array([[1, 0], [0, -1]], dtype=np.complex64)
    eye = np.eye(2, dtype=np.complex64)
    return np.stack([(eye + s[k, 0] * sx + s[k, 1] * sy + s[k, 2] * sz) / 4.0
                     for k in range(K_POVM)]).astype(np.complex64)   # (K, 2, 2)


def build_kron_ops(m_povm, n):
    a = m_povm
    for _ in range(n - 1):
        ka, da, _ = a.shape
        kb, db, _ = m_povm.shape
        a = np.einsum('aij,bkl->abikjl', a, m_povm).reshape(ka * kb, da * db, da * db)
    return a                                                          # (K^n, 2^n, 2^n)


def reference_forward(x, w1, b1, alpha, w2, b2, kron_ops, p_idxs):
    h = x @ w1 + b1[0]
    h = jnp.where(h > 0, h, alpha[0] * h)
    out = h @ w2 + b2[0]
    t_m = out.reshape(DIM, DIM)
    t = jnp.tril(t_m) + 1j * jnp.triu(t_m, 1).T
    t = t + jnp.tril(t, -1).T.conj()
    temp = t.conj().T @ t
    rho = temp / jnp.trace(temp)
    p_all = jnp.real(jnp.einsum('kji,ij->k', kron_ops, rho))
    return p_all[p_idxs]


if __name__ == "__main__":
    # P_idxs: subset of the K^N POVM outcomes actually measured; in_size = len(P_idxs)
    p_idxs = np.arange(48, dtype=np.int32)
    in_size = int(p_idxs.shape[0])

    key = jax.random.PRNGKey(0)
    k1, k2, k3, k4, kx = jax.random.split(key, 5)
    w1 = (jax.random.uniform(k1, (in_size, HIDDEN), jnp.float32, -1.0, 1.0)
          / np.sqrt(in_size)).astype(jnp.float32)
    b1 = (jax.random.uniform(k2, (1, HIDDEN), jnp.float32, -1.0, 1.0)
          / np.sqrt(in_size)).astype(jnp.float32)
    w2 = (jax.random.uniform(k3, (HIDDEN, OUT_SIZE), jnp.float32, -1.0, 1.0)
          / np.sqrt(HIDDEN)).astype(jnp.float32)
    b2 = (jax.random.uniform(k4, (1, OUT_SIZE), jnp.float32, -1.0, 1.0)
          / np.sqrt(HIDDEN)).astype(jnp.float32)
    alpha = jnp.array([0.25], dtype=jnp.float32)          # PReLU default slope

    # Measured probability vector as network input
    x = jax.random.uniform(kx, (in_size,), jnp.float32, 0.0, 1.0)
    x = x / jnp.sum(x)

    # POVM M (K,2,2) and its N-fold tensor products (plain numpy, host-side)
    m_povm = tetrahedral_povm()
    kron_ops = build_kron_ops(m_povm, NUM_QUBITS)          # (K^N, 2^N, 2^N) complex

    # --- host-side constant folding (chol_h map, Gram fold, POVM contraction, gather) ---
    q_fold = build_chol_fold()                                         # (64, 128), exact ±1
    w2c = np.asarray(w2, np.float64) @ q_fold                          # (6, 128)
    b2c = np.asarray(b2, np.float64) @ q_fold                          # (1, 128)
    w2c_aug = np.concatenate([w2c, b2c], axis=0)                       # (7, 128)

    gram2 = build_gram_fold(w2c_aug)                                   # (49, 256)
    bg = build_measure_matrix(kron_ops, p_idxs)                        # (256, 48)
    mout = jnp.asarray(gram2 @ bg, jnp.float32)                        # (49, 48)

    trv = np.zeros((GLANES,), np.float64)
    trv[np.arange(CDIM) * CDIM + np.arange(CDIM)] = 1.0                # selects diag of G
    trrow = jnp.asarray((gram2 @ trv).reshape(1, -1), jnp.float32)     # (1, 49)

    tspr_np, trep_np = build_h2_maps()
    tspr = jnp.asarray(tspr_np, jnp.float32)                           # (7, 49)
    trep = jnp.asarray(trep_np, jnp.float32)                           # (7, 49)

    # Layer-1 weights augmented with a constant-1 feature (PReLU(1)=1 keeps it intact)
    w1a = jnp.asarray(np.concatenate([np.asarray(w1, np.float32),
                                      np.zeros((in_size, 1), np.float32)], axis=1))
    b1a = jnp.asarray(np.concatenate([np.asarray(b1, np.float32),
                                      np.ones((1, 1), np.float32)], axis=1))

    fwd = jax.jit(generator_forward)
    d_out = fwd(x, alpha, w1a, b1a, tspr, trep, trrow, mout)
    d_out = jax.block_until_ready(d_out)

    ref = reference_forward(x, w1, b1, alpha, w2, b2,
                            jnp.asarray(kron_ops, jnp.complex64), jnp.asarray(p_idxs))
    assert d_out.shape == (in_size,)
    assert bool(jnp.all(jnp.isfinite(d_out)))
    np.testing.assert_allclose(np.asarray(d_out), np.asarray(ref), rtol=1e-3, atol=1e-4)

    print("KERNEL_OK")
</pallas_src>

<mosaic_0001>
module attributes {stable_mosaic.version = 11 : i64} {
  func.func @generator_kernel(%arg0: memref<1xf32, #tpu.memory_space<smem>>, %arg1: memref<1x48xf32, #tpu.memory_space<vmem>>, %arg2: memref<48x7xf32, #tpu.memory_space<vmem>>, %arg3: memref<1x7xf32, #tpu.memory_space<vmem>>, %arg4: memref<7x49xf32, #tpu.memory_space<vmem>>, %arg5: memref<7x49xf32, #tpu.memory_space<vmem>>, %arg6: memref<1x49xf32, #tpu.memory_space<vmem>>, %arg7: memref<49x48xf32, #tpu.memory_space<vmem>>, %arg8: memref<1x48xf32, #tpu.memory_space<vmem>>) attributes {dimension_semantics = [], scalar_prefetch = 0 : i64, scratch_operands = 0 : i64, tpu.core_type = #tpu.core_type<tc>} {
    %c0 = arith.constant 0 : index
    %c0_0 = arith.constant 0 : index
    %0 = vector.load %arg1[%c0, %c0_0] : memref<1x48xf32, #tpu.memory_space<vmem>>, vector<1x48xf32>
    %c0_1 = arith.constant 0 : index
    %c0_2 = arith.constant 0 : index
    %1 = vector.load %arg2[%c0_1, %c0_2] : memref<48x7xf32, #tpu.memory_space<vmem>>, vector<48x7xf32>
    %cst = arith.constant dense<0.000000e+00> : vector<1x7xf32>
    %2 = tpu.matmul %0, %1, %cst {dimension_numbers = #tpu.dot_dimension_numbers<[1], [0], [0], [1], [0, 0, 1, 1], [], []>} : vector<1x48xf32>, vector<48x7xf32>, vector<1x7xf32> -> vector<1x7xf32>
    %c0_3 = arith.constant 0 : index
    %c0_4 = arith.constant 0 : index
    %3 = vector.load %arg3[%c0_3, %c0_4] : memref<1x7xf32, #tpu.memory_space<vmem>>, vector<1x7xf32>
    %4 = arith.addf %2, %3 : vector<1x7xf32>
    %c0_5 = arith.constant 0 : index
    %5 = memref.load %arg0[%c0_5] : memref<1xf32, #tpu.memory_space<smem>>
    %cst_6 = arith.constant 0.000000e+00 : f32
    %6 = vector.broadcast %cst_6 : f32 to vector<1x7xf32>
    %7 = arith.cmpf ogt, %4, %6 : vector<1x7xf32>
    %8 = vector.broadcast %5 : f32 to vector<1x7xf32>
    %9 = arith.mulf %8, %4 : vector<1x7xf32>
    %10 = arith.select %7, %4, %9 : vector<1x7xi1>, vector<1x7xf32>
    %c0_7 = arith.constant 0 : index
    %c0_8 = arith.constant 0 : index
    %11 = vector.load %arg4[%c0_7, %c0_8] : memref<7x49xf32, #tpu.memory_space<vmem>>, vector<7x49xf32>
    %cst_9 = arith.constant dense<0.000000e+00> : vector<1x49xf32>
    %12 = tpu.matmul %10, %11, %cst_9 {dimension_numbers = #tpu.dot_dimension_numbers<[1], [0], [0], [1], [0, 0, 1, 1], [], []>} : vector<1x7xf32>, vector<7x49xf32>, vector<1x49xf32> -> vector<1x49xf32>
    %c0_10 = arith.constant 0 : index
    %c0_11 = arith.constant 0 : index
    %13 = vector.load %arg5[%c0_10, %c0_11] : memref<7x49xf32, #tpu.memory_space<vmem>>, vector<7x49xf32>
    %cst_12 = arith.constant dense<0.000000e+00> : vector<1x49xf32>
    %14 = tpu.matmul %10, %13, %cst_12 {dimension_numbers = #tpu.dot_dimension_numbers<[1], [0], [0], [1], [0, 0, 1, 1], [], []>} : vector<1x7xf32>, vector<7x49xf32>, vector<1x49xf32> -> vector<1x49xf32>
    %15 = arith.mulf %12, %14 : vector<1x49xf32>
    %c0_13 = arith.constant 0 : index
    %c0_14 = arith.constant 0 : index
    %16 = vector.load %arg6[%c0_13, %c0_14] : memref<1x49xf32, #tpu.memory_space<vmem>>, vector<1x49xf32>
    %17 = arith.mulf %15, %16 : vector<1x49xf32>
    %18 = vector.shape_cast %17 : vector<1x49xf32> to vector<1x1x49xf32>
    %cst_15 = arith.constant dense<0.000000e+00> : vector<1xf32>
    %19 = vector.multi_reduction <add>, %18, %cst_15 [1, 2] : vector<1x1x49xf32> to vector<1xf32>
    %20 = vector.shape_cast %19 : vector<1xf32> to vector<1x1x1xf32>
    %21 = vector.extract %20[0, 0, 0] : f32 from vector<1x1x1xf32>
    %cst_16 = arith.constant 1.000000e+00 : f32
    %22 = arith.divf %cst_16, %21 : f32
    %c0_17 = arith.constant 0 : index
    %c0_18 = arith.constant 0 : index
    %23 = vector.load %arg7[%c0_17, %c0_18] : memref<49x48xf32, #tpu.memory_space<vmem>>, vector<49x48xf32>
    %cst_19 = arith.constant dense<0.000000e+00> : vector<1x48xf32>
    %24 = tpu.matmul %15, %23, %cst_19 {dimension_numbers = #tpu.dot_dimension_numbers<[1], [0], [0], [1], [0, 0, 1, 1], [], []>} : vector<1x49xf32>, vector<49x48xf32>, vector<1x48xf32> -> vector<1x48xf32>
    %25 = vector.broadcast %22 : f32 to vector<1x48xf32>
    %26 = arith.mulf %24, %25 : vector<1x48xf32>
    %c0_20 = arith.constant 0 : index
    %c0_21 = arith.constant 0 : index
    %27 = vector.load %arg8[%c0_20, %c0_21] : memref<1x48xf32, #tpu.memory_space<vmem>>, vector<1x48xf32>
    tpu.vector_store %arg8[%c0_20, %c0_21], %26 {strides = array<i32>} : memref<1x48xf32, #tpu.memory_space<vmem>>, vector<1x48xf32>,
    return
  }
}

</mosaic_0001>

<bundles_post_ra>
// kernel: generator_forward.1
= control target key start
LH: loop header
LB: loop body
LE: loop exit
PB: predicated region body
PF: predicated region fallthrough
CT: control target
= control target key end

     0   :  { %s352_s0 = inlined_call_operand.<no memory space> [shape: f32[1], index: 0, kind: input, shape index: {}]   ;;  %s353_s1 = inlined_call_operand.vmem [shape: f32[1,48], index: 1, kind: input, shape index: {}]   ;;  %s354_s2 = inlined_call_operand.vmem [shape: f32[48,7], index: 2, kind: input, shape index: {}]   ;;  %s355_s3 = inlined_call_operand.vmem [shape: f32[1,7], index: 3, kind: input, shape index: {}]   ;;  %s356_s4 = inlined_call_operand.vmem [shape: f32[7,49], index: 4, kind: input, shape index: {}]   ;;  %s357_s5 = inlined_call_operand.vmem [shape: f32[7,49], index: 5, kind: input, shape index: {}]   ;;  %s358_s6 = inlined_call_operand.vmem [shape: f32[1,49], index: 6, kind: input, shape index: {}]   ;;  %s359_s7 = inlined_call_operand.vmem [shape: f32[49,48], index: 7, kind: input, shape index: {}]   ;;  %s360_s8 = inlined_call_operand.hbm [shape: f32[1,48], index: 8, kind: output, shape index: {}]  }
   0x1   :  { %v37_v0 = vld [vmem:[%s354_s2 + $0x28] sm:$0xff]  ;;  %v36_v1 = vld [vmem:[%s354_s2 + $0x20] sm:$0xff]  ;;  %v35_v2 = vld [vmem:[%s354_s2 + $0x18] sm:$0xff] }
   0x2   :  { %53 = vmatpush.msra.mxu0 %v37_v0 }
   0x3   :  { %14 = vsyncpa [#allocation4], 0  ;;  %v34_v3 = vld [vmem:[%s354_s2 + $0x10] sm:$0xff]  ;;  %v33_v4 = vld [vmem:[%s354_s2 + $0x8] sm:$0xff]  ;;  %vm39_vm0 = vcmask 392192   ;;  %vm73_vm1 = vcmask 1046528   ;;  %v65_v13 = vstv %s352_s0 }
   0x4   :  { %54 = vmatpush.msra.mxu0 %v36_v1  ;;  %v32_v5 = vld [vmem:[%s354_s2] sm:$0xff]  ;;  %v157_v9 = vld [vmem:[%s359_s7 + $0x30] sm:$0x1]  ;;  %vm162_vm2 = vcmask 1040384   ;;  %v156_v10 = vld [vmem:[%s359_s7 + $0x28] sm:$0xff]  ;;  %vm69_vm4 = vcmask 56320  }
   0x5   :  { %v31_v6 = vld [vmem:[%s353_s1] sm:$0x1]  ;;  %211 = vmatpush.msk.msra.mxu3 %vm162_vm2, %v157_v9  ;;  %v154_v18 = vld [vmem:[%s359_s7 + $0x18] sm:$0xff]  ;;  %v153_v19 = vld [vmem:[%s359_s7 + $0x10] sm:$0xff]  ;;  %vm158_vm5 = vcmask 400384   ;;  %vm124_vm6 = vcmask 393216  }
   0x6   :  { %55 = vmatpush.msra.mxu0 %v35_v2  ;;  %v68_v7 = vld [vmem:[%s356_s4] sm:$0x7f]  ;;  %v152_v20 = vld [vmem:[%s359_s7 + $0x8] sm:$0xff]  ;;  %s197_s18 = sshll.u32 %s360_s8, 4  ;;  %vm188_vm11 = vcmask 385024   ;;  %s198_s18 = int_to_ptr.hbm [resolvable:$true] %s197_s18 }
   0x7   :  { %v97_v8 = vld [vmem:[%s357_s5] sm:$0x7f]  ;;  %207 = vmatpush.msk.msra.mxu1 %vm73_vm1, %v68_v7  ;;  %176 = vmatpush.msra.mxu3 %v156_v10 }
   0x8   :  { %56 = vmatpush.msra.mxu0 %v34_v3  ;;  %209 = vmatpush.msk.msra.mxu2 %vm73_vm1, %v97_v8  ;;  %v38_v11 = vld [vmem:[%s355_s3] sm:$0x1] }
   0x9   :  { %v155_v17 = vld [vmem:[%s359_s7 + $0x20] sm:$0xff] }
   0xa   :  { %57 = vmatpush.msra.mxu0 %v33_v4  ;;  %177 = vmatpush.msra.mxu3 %v155_v17  ;;  %v151_v21 = vld [vmem:[%s359_s7] sm:$0xff] }
   0xb   :  { %v122_v24 = vld [vmem:[%s358_s6] sm:$0x1]  ;;  %s246_s6 = smov [#allocation3]  }
   0xc   :  { %58 = vmatpush.msra.mxu0 %v32_v5  ;;  %178 = vmatpush.msra.mxu3 %v154_v18  ;;  %s195_s15 = sshll.u32 %s246_s6, 4  ;;  %s196_s15 = int_to_ptr.vmem [resolvable:$true] %s195_s15 }
   0xd   :  { %206 = vmatmul.msk.f32.vlgmr.msra.gmra.mxu0 %vm39_vm0, %v31_v6 }
   0xe   :  { %179 = vmatpush.msra.mxu3 %v153_v19 }
  0x10   :  { %180 = vmatpush.msra.mxu3 %v152_v20 }
  0x12   :  { %181 = vmatpush.msra.mxu3 %v151_v21 }
  0x8a   :  { %v60_v12 = vpop.f32.mrf.mxu0 }
  0x8b   :  { %v61_v14 = vadd.f32 %v60_v12, %v38_v11 }
  0x8d   :  { %v66_v15 = vmul.f32 %v65_v13, %v61_v14  ;;  %vm64_vm3 = vcmp.gt.f32.partialorder %v61_v14, 0.0 }
  0x8f   :  { %v67_v16 = vsel %vm64_vm3, %v61_v14, %v66_v15 }
  0x90   :  { %208 = vmatmul.msk.f32.vlgmr.msra.gmra.mxu1 %vm69_vm4, %v67_v16  ;;  %210 = vmatmul.msk.f32.vlgmr.msra.gmra.mxu2 %vm69_vm4, %v67_v16 }
 0x10d   :  { %v94_v22 = vpop.f32.mrf.mxu1 }
 0x113   :  { %v118_v23 = vpop.f32.mrf.mxu2 }
 0x114   :  { %v121_v25 = vmul.f32 %v118_v23, %v94_v22 }
 0x116   :  { %212 = vmatmul.msk.f32.vlgmr.msra.gmra.mxu3 %vm158_vm5, %v121_v25  ;;  %v123_v26 = vmul.f32 %v122_v24, %v121_v25 }
 0x118   :  { %v125_v27 = vsel %vm124_vm6, %v123_v26, 0.0 }
 0x119   :  { %126 = vadd.xlane.f32.xlu0 %v125_v27 }
 0x18c   :  { %v127_v28 = vpop.xlane.xlu0 %126 }
 0x18d   :  { %v128_v29 = vrot.slane %v127_v28, 4 }
 0x18f   :  { %v129_v30 = vadd.f32 %v128_v29, %v127_v28 }
 0x191   :  { %v130_v31 = vrot.slane %v129_v30, 2 }
 0x193   :  { %v131_v32 = vadd.f32 %v130_v31, %v129_v30 }
 0x195   :  { %v132_v33 = vrot.slane %v131_v32, 1 }
 0x197   :  { %v133_v34 = vadd.f32 %v132_v33, %v131_v32 }
 0x199   :  { %213 = vpush %v133_v34  ;;  %v183_v46 = vpop.f32.mrf.mxu3 }
 0x1ca   :  { %s214_s7 = spop %213 }
 0x1cb   :  { %v135_v35 = vstv %s214_s7 }
 0x1cc   :  { %218 = vrcp.f32 %v135_v35  ;;  %v147_v39 = vand.u32 2147483648, %v135_v35  ;;  %v145_v41 = vand.u32 2147483647, %v135_v35  ;;  %vm141_vm8 = vweird.f32 %v135_v35 }
 0x1ce   :  { %v148_v43 = vor.u32 1.1754944e-38, %v147_v39  ;;  %vm146_vm10 = vcmp.eq.f32.partialorder %v145_v41, 8.507059e+37 }
 0x1d2   :  { %v219_v36 = vpop.eup %218 }
 0x1d3   :  { %v137_v37 = vmul.f32 %v219_v36, %v135_v35  ;;  %vm142_vm7 = vweird.f32 %v219_v36 }
 0x1d4   :  { %vm143_vm9 = vmor %vm141_vm8, %vm142_vm7 }
 0x1d5   :  { %v138_v38 = vsub.f32 1.0, %v137_v37 }
 0x1d7   :  { %v139_v40 = vmul.f32 %v219_v36, %v138_v38 }
 0x1d9   :  { %v140_v42 = vadd.f32 %v219_v36, %v139_v40 }
 0x1db   :  { %v144_v44 = vsel %vm143_vm9, %v219_v36, %v140_v42 }
 0x1dc   :  { %v149_v45 = vsel %vm146_vm10, %v148_v43, %v144_v44 }
 0x1dd   :  { %215 = vpush %v149_v45 }
 0x20e   :  { %s216_s19 = spop %215 }
 0x20f   :  { %v186_v47 = vstv %s216_s19 }
 0x210   :  { %v187_v48 = vmul.f32 %v186_v47, %v183_v46 }
 0x212   :  { %189 = vst.msk [vmem:[#allocation3] sm:$0x1] %vm188_vm11, %v187_v48 }
 0x213   :  { %200 = dma.vmem_to_hbm [thread:$0]  %s196_s15, 16, %s198_s18, [#allocation4]  }
 0x214   :  { %244 = dma.done.wait [#allocation4], 16  }
 0x215   :  { %245 = vsyncadd [#allocation4], 4294967280 }
 0x216   :  { %205 = vsyncpa [#allocation4], 1 }

</bundles_post_ra>
